<compile_context>
chip_gen: v7x
topology: tpu7x:2x2x1
jax: 0.10.0
libtpu: 0.0.40
codegen_flags: <defaults>
</compile_context>

<pallas_src>
import jax
import jax.numpy as jnp
from jax.experimental import pallas as pl
from jax.experimental.pallas import tpu as pltpu


def _round_up(n, m):
    return ((n + m - 1) // m) * m


def _adversarial_kernel(x_ref, w1_ref, b1_ref, w2_ref, b2_ref, w3_ref, b3_ref,
                        o_ref):
    # x_ref : [TB, F] f32   (natural layout; no wrapper-side transpose/cast)
    # w*_ref: transposed weights [out, in] bf16, resident in VMEM across grid
    # b*_ref: [out, 1] f32
    # o_ref : [n_class, TB] f32 (lane-dense: batch on the lane axis)

    # In-kernel layout plumbing: f32 transpose (XLU) then bf16 cast, so the
    # only HBM traffic for x is the single f32 read done by the pipelined DMA.
    xt = jnp.transpose(x_ref[...]).astype(jnp.bfloat16)           # [F, TB] bf16

    # Layer 1: Linear + ReLU (bf16 MXU matmul, f32 accumulate, f32 epilogue)
    h1 = jnp.dot(w1_ref[...], xt, preferred_element_type=jnp.float32)
    h1 = jnp.maximum(h1 + b1_ref[...], 0.0)                       # [H1, TB] f32

    # Dropout (p=0.2) -> identity in eval mode.

    # Layer 2: Linear + ReLU
    h2 = jnp.dot(w2_ref[...], h1.astype(jnp.bfloat16),
                 preferred_element_type=jnp.float32)
    h2 = jnp.maximum(h2 + b2_ref[...], 0.0)                       # [H2, TB] f32

    # Dropout (p=0.2) -> identity in eval mode.

    # Layer 3: Linear (logits), lane-dense full-width store
    out = jnp.dot(w3_ref[...], h2.astype(jnp.bfloat16),
                  preferred_element_type=jnp.float32)
    o_ref[...] = (out + b3_ref[...]).astype(o_ref.dtype)          # [C, TB]


def _adversarial_xla(x, params):
    """Plain-XLA fused fallback for small batches (pure f32)."""
    h1 = jax.nn.relu(x @ params["w1"] + params["b1"])
    h2 = jax.nn.relu(h1 @ params["w2"] + params["b2"])
    return h2 @ params["w3"] + params["b3"]


def adversarial_forward(x, params, *, block_batch=8192, min_pallas_batch=512,
                        force_pallas=False, lane_major_output=False):
    """x: [B, n_features] f32. params: dict of w1,b1,w2,b2,w3,b3 ([in,out]/[1,out])."""
    w1, b1 = params["w1"], params["b1"]
    w2, b2 = params["w2"], params["b2"]
    w3, b3 = params["w3"], params["b3"]

    B, F = x.shape
    H1, H2, n_class = w1.shape[1], w2.shape[1], w3.shape[1]

    # Small batches: the pallas_call would be 100% launch/prologue overhead.
    if not force_pallas and B <= min_pallas_batch:
        out = _adversarial_xla(x, params)
        return out.T if lane_major_output else out

    # ---- batch-tile selection ----------------------------------------------
    block_batch = max(128, _round_up(block_batch, 128))
    # Keep >= 2 grid steps when possible so the "parallel" batch axis can be
    # sharded across both TensorCores on megacore parts (v7x).
    half = _round_up(max(-(-B // 2), 1), 128)
    TB = min(block_batch, max(128, half))
    B_pad = _round_up(B, TB)
    grid = (B_pad // TB,)

    # ---- VMEM budget (per grid step), padding-aware, + headroom ------------
    LANE, SUB = 128, 8
    x_buf = 2 * TB * _round_up(F, LANE) * 4            # double-buffered x tile
    o_buf = 2 * _round_up(n_class, SUB) * TB * 4       # double-buffered out tile
    vals = (TB * _round_up(F, LANE) * 4                # loaded x value (lane-padded)
            + TB * _round_up(F, SUB) * 4               # f32 transpose result
            + TB * _round_up(F, 16) * 2                # bf16 xt
            + TB * (H1 * (4 + 2) + H2 * (4 + 2))       # h1/h2 f32 + bf16 copies
            + TB * _round_up(n_class, SUB) * 4)        # out f32
    weights = 2 * (F * H1 + H1 * H2 + H2 * n_class) + 4 * (H1 + H2 + n_class)
    vmem_limit = int(1.5 * (x_buf + o_buf + vals + weights)) + (1 << 20)
    vmem_limit = min(max(vmem_limit, 16 << 20), 100 << 20)

    # ---- operands -----------------------------------------------------------
    x = x.astype(jnp.float32)
    if B_pad != B:
        x = jnp.pad(x, ((0, B_pad - B), (0, 0)))       # [B_pad, F]

    w1t = w1.T.astype(jnp.bfloat16)                    # [H1, F]
    w2t = w2.T.astype(jnp.bfloat16)                    # [H2, H1]
    w3t = w3.T.astype(jnp.bfloat16)                    # [C,  H2]
    b1c = b1.reshape(-1, 1).astype(jnp.float32)        # [H1, 1]
    b2c = b2.reshape(-1, 1).astype(jnp.float32)        # [H2, 1]
    b3c = b3.reshape(-1, 1).astype(jnp.float32)        # [C,  1]

    # Full-array, grid-invariant blocks -> weights stay resident across batch loop.
    resident = lambda a: pl.BlockSpec(a.shape, lambda j, _a=a: (0,) * _a.ndim)

    out_t = pl.pallas_call(
        _adversarial_kernel,
        out_shape=jax.ShapeDtypeStruct((n_class, B_pad), jnp.float32),
        grid=grid,
        in_specs=[
            pl.BlockSpec((TB, F), lambda j: (j, 0)),   # x tile (pipelined DMA)
            resident(w1t), resident(b1c),
            resident(w2t), resident(b2c),
            resident(w3t), resident(b3c),
        ],
        out_specs=pl.BlockSpec((n_class, TB), lambda j: (0, j)),
        compiler_params=pltpu.CompilerParams(
            dimension_semantics=("parallel",),          # megacore-shard batch axis
            vmem_limit_bytes=vmem_limit),
    )(x, w1t, b1c, w2t, b2c, w3t, b3c)

    out_t = out_t[:, :B]                                # [n_class, B]
    if lane_major_output:
        return out_t                                    # skip the un-transpose
    return out_t.T                                      # [B, n_class] (module parity)


def init_params(key, n_features, n_class=2, n_hidden=32):
    """Deterministic synthetic parameters (Kaiming-uniform-ish scaling)."""
    k1, k2, k3, k4, k5, k6 = jax.random.split(key, 6)

    def lin(kw, kb, fan_in, fan_out):
        bound = 1.0 / jnp.sqrt(fan_in)
        w = jax.random.uniform(kw, (fan_in, fan_out), jnp.float32, -bound, bound)
        b = jax.random.uniform(kb, (1, fan_out), jnp.float32, -bound, bound)
        return w, b

    w1, b1 = lin(k1, k2, n_features, 2 * n_hidden)
    w2, b2 = lin(k3, k4, 2 * n_hidden, n_hidden)
    w3, b3 = lin(k5, k6, n_hidden, n_class)
    return {"w1": w1, "b1": b1, "w2": w2, "b2": b2, "w3": w3, "b3": b3}


if __name__ == "__main__":
    n_features, n_class, n_hidden = 16, 2, 32
    batch = 8  # demo size; force_pallas exercises the kernel despite the fallback

    key = jax.random.PRNGKey(0)
    kx, kp = jax.random.split(key)
    x = jax.random.normal(kx, (batch, n_features), jnp.float32)
    params = init_params(kp, n_features, n_class, n_hidden)

    # Force the Pallas path (the auto path routes B<=512 to the XLA fallback).
    out = adversarial_forward(x, params, force_pallas=True)
    jax.block_until_ready(out)
    assert out.shape == (batch, n_class)

    # Pure-JAX reference matching the kernel numerics (bf16 MXU operands,
    # f32 accumulation, f32 bias/ReLU; dropout = identity in eval mode).
    bf = jnp.bfloat16
    h1 = jnp.maximum(
        jnp.dot(x.astype(bf), params["w1"].astype(bf),
                preferred_element_type=jnp.float32) + params["b1"], 0.0)
    h2 = jnp.maximum(
        jnp.dot(h1.astype(bf), params["w2"].astype(bf),
                preferred_element_type=jnp.float32) + params["b2"], 0.0)
    ref = jnp.dot(h2.astype(bf), params["w3"].astype(bf),
                  preferred_element_type=jnp.float32) + params["b3"]
    assert jnp.allclose(out, ref, atol=1e-3, rtol=1e-3)

    # Auto path (small-batch XLA fallback, pure f32) agrees within bf16 tolerance.
    out_xla = adversarial_forward(x, params)
    jax.block_until_ready(out_xla)
    assert jnp.allclose(out, out_xla, atol=1e-1, rtol=1e-1)

    print("KERNEL_OK")
</pallas_src>

<mosaic_0001>
module attributes {stable_mosaic.version = 11 : i64} {
  func.func @_adversarial_kernel(%arg0: i32, %arg1: memref<128x16xf32, #tpu.memory_space<vmem>>, %arg2: memref<64x16xbf16, #tpu.memory_space<vmem>>, %arg3: memref<64x1xf32, #tpu.memory_space<vmem>>, %arg4: memref<32x64xbf16, #tpu.memory_space<vmem>>, %arg5: memref<32x1xf32, #tpu.memory_space<vmem>>, %arg6: memref<2x32xbf16, #tpu.memory_space<vmem>>, %arg7: memref<2x1xf32, #tpu.memory_space<vmem>>, %arg8: memref<2x128xf32, #tpu.memory_space<vmem>>) attributes {dimension_semantics = [#tpu.dimension_semantics<parallel>], iteration_bounds = array<i64: 1>, scalar_prefetch = 0 : i64, scratch_operands = 0 : i64, tpu.core_type = #tpu.core_type<tc>, window_params = [{transform_indices = @transform_0, window_bounds = array<i64: 128, 16>}, {pipeline_mode = #tpu.pipeline_mode<synchronous>, transform_indices = @transform_1, window_bounds = array<i64: 64, 16>}, {pipeline_mode = #tpu.pipeline_mode<synchronous>, transform_indices = @transform_2, window_bounds = array<i64: 64, 1>}, {pipeline_mode = #tpu.pipeline_mode<synchronous>, transform_indices = @transform_3, window_bounds = array<i64: 32, 64>}, {pipeline_mode = #tpu.pipeline_mode<synchronous>, transform_indices = @transform_4, window_bounds = array<i64: 32, 1>}, {pipeline_mode = #tpu.pipeline_mode<synchronous>, transform_indices = @transform_5, window_bounds = array<i64: 2, 32>}, {pipeline_mode = #tpu.pipeline_mode<synchronous>, transform_indices = @transform_6, window_bounds = array<i64: 2, 1>}, {transform_indices = @transform_7, window_bounds = array<i64: 2, 128>}]} {
    %c0 = arith.constant 0 : index
    %c0_0 = arith.constant 0 : index
    %0 = vector.load %arg1[%c0, %c0_0] : memref<128x16xf32, #tpu.memory_space<vmem>>, vector<128x16xf32>
    %1 = tpu.transpose %0, [1, 0] : vector<128x16xf32> -> vector<16x128xf32>
    %2 = arith.truncf %1 : vector<16x128xf32> to vector<16x128xbf16>
    %c0_1 = arith.constant 0 : index
    %c0_2 = arith.constant 0 : index
    %3 = vector.load %arg2[%c0_1, %c0_2] : memref<64x16xbf16, #tpu.memory_space<vmem>>, vector<64x16xbf16>
    %cst = arith.constant dense<0.000000e+00> : vector<64x128xf32>
    %4 = tpu.matmul %3, %2, %cst {dimension_numbers = #tpu.dot_dimension_numbers<[1], [0], [0], [1], [0, 0, 1, 1], [], []>} : vector<64x16xbf16>, vector<16x128xbf16>, vector<64x128xf32> -> vector<64x128xf32>
    %c0_3 = arith.constant 0 : index
    %c0_4 = arith.constant 0 : index
    %5 = vector.load %arg3[%c0_3, %c0_4] : memref<64x1xf32, #tpu.memory_space<vmem>>, vector<64x1xf32>
    %6 = vector.broadcast %5 : vector<64x1xf32> to vector<64x128xf32>
    %7 = arith.addf %4, %6 : vector<64x128xf32>
    %cst_5 = arith.constant 0.000000e+00 : f32
    %8 = vector.broadcast %cst_5 : f32 to vector<64x128xf32>
    %9 = arith.maximumf %7, %8 : vector<64x128xf32>
    %c0_6 = arith.constant 0 : index
    %c0_7 = arith.constant 0 : index
    %10 = vector.load %arg4[%c0_6, %c0_7] : memref<32x64xbf16, #tpu.memory_space<vmem>>, vector<32x64xbf16>
    %11 = arith.truncf %9 : vector<64x128xf32> to vector<64x128xbf16>
    %cst_8 = arith.constant dense<0.000000e+00> : vector<32x128xf32>
    %12 = tpu.matmul %10, %11, %cst_8 {dimension_numbers = #tpu.dot_dimension_numbers<[1], [0], [0], [1], [0, 0, 1, 1], [], []>} : vector<32x64xbf16>, vector<64x128xbf16>, vector<32x128xf32> -> vector<32x128xf32>
    %c0_9 = arith.constant 0 : index
    %c0_10 = arith.constant 0 : index
    %13 = vector.load %arg5[%c0_9, %c0_10] : memref<32x1xf32, #tpu.memory_space<vmem>>, vector<32x1xf32>
    %14 = vector.broadcast %13 : vector<32x1xf32> to vector<32x128xf32>
    %15 = arith.addf %12, %14 : vector<32x128xf32>
    %cst_11 = arith.constant 0.000000e+00 : f32
    %16 = vector.broadcast %cst_11 : f32 to vector<32x128xf32>
    %17 = arith.maximumf %15, %16 : vector<32x128xf32>
    %c0_12 = arith.constant 0 : index
    %c0_13 = arith.constant 0 : index
    %18 = vector.load %arg6[%c0_12, %c0_13] : memref<2x32xbf16, #tpu.memory_space<vmem>>, vector<2x32xbf16>
    %19 = arith.truncf %17 : vector<32x128xf32> to vector<32x128xbf16>
    %cst_14 = arith.constant dense<0.000000e+00> : vector<2x128xf32>
    %20 = tpu.matmul %18, %19, %cst_14 {dimension_numbers = #tpu.dot_dimension_numbers<[1], [0], [0], [1], [0, 0, 1, 1], [], []>} : vector<2x32xbf16>, vector<32x128xbf16>, vector<2x128xf32> -> vector<2x128xf32>
    %c0_15 = arith.constant 0 : index
    %c0_16 = arith.constant 0 : index
    %21 = vector.load %arg7[%c0_15, %c0_16] : memref<2x1xf32, #tpu.memory_space<vmem>>, vector<2x1xf32>
    %22 = vector.broadcast %21 : vector<2x1xf32> to vector<2x128xf32>
    %23 = arith.addf %20, %22 : vector<2x128xf32>
    %c0_17 = arith.constant 0 : index
    %c0_18 = arith.constant 0 : index
    %24 = vector.load %arg8[%c0_17, %c0_18] : memref<2x128xf32, #tpu.memory_space<vmem>>, vector<2x128xf32>
    tpu.vector_store %arg8[%c0_17, %c0_18], %23 {strides = array<i32>} : memref<2x128xf32, #tpu.memory_space<vmem>>, vector<2x128xf32>,
    return
  }
  func.func @transform_0(%arg0: i32) -> (i32, i32) {
    %c0_i32 = arith.constant 0 : i32
    %c0_i32_0 = arith.constant 0 : i32
    return %arg0, %c0_i32 : i32, i32
  }
  func.func @transform_1(%arg0: i32) -> (i32, i32) {
    %c0_i32 = arith.constant 0 : i32
    %c0_i32_0 = arith.constant 0 : i32
    %c0_i32_1 = arith.constant 0 : i32
    return %c0_i32, %c0_i32_0 : i32, i32
  }
  func.func @transform_2(%arg0: i32) -> (i32, i32) {
    %c0_i32 = arith.constant 0 : i32
    %c0_i32_0 = arith.constant 0 : i32
    %c0_i32_1 = arith.constant 0 : i32
    return %c0_i32, %c0_i32_0 : i32, i32
  }
  func.func @transform_3(%arg0: i32) -> (i32, i32) {
    %c0_i32 = arith.constant 0 : i32
    %c0_i32_0 = arith.constant 0 : i32
    %c0_i32_1 = arith.constant 0 : i32
    return %c0_i32, %c0_i32_0 : i32, i32
  }
  func.func @transform_4(%arg0: i32) -> (i32, i32) {
    %c0_i32 = arith.constant 0 : i32
    %c0_i32_0 = arith.constant 0 : i32
    %c0_i32_1 = arith.constant 0 : i32
    return %c0_i32, %c0_i32_0 : i32, i32
  }
  func.func @transform_5(%arg0: i32) -> (i32, i32) {
    %c0_i32 = arith.constant 0 : i32
    %c0_i32_0 = arith.constant 0 : i32
    %c0_i32_1 = arith.constant 0 : i32
    return %c0_i32, %c0_i32_0 : i32, i32
  }
  func.func @transform_6(%arg0: i32) -> (i32, i32) {
    %c0_i32 = arith.constant 0 : i32
    %c0_i32_0 = arith.constant 0 : i32
    %c0_i32_1 = arith.constant 0 : i32
    return %c0_i32, %c0_i32_0 : i32, i32
  }
  func.func @transform_7(%arg0: i32) -> (i32, i32) {
    %c0_i32 = arith.constant 0 : i32
    %c0_i32_0 = arith.constant 0 : i32
    return %c0_i32, %arg0 : i32, i32
  }
}

</mosaic_0001>

<bundles_post_ra>
// kernel: tpu_custom_call.1
= control target key start
LH: loop header
LB: loop body
LE: loop exit
PB: predicated region body
PF: predicated region fallthrough
CT: control target
= control target key end

     0   :  { %vm153_vm0 = vcmask 130048   ;;  %s672_s0 = inlined_call_operand.vmem [shape: f32[128,16], index: 0, kind: input, shape index: {}]   ;;  %s673_s1 = inlined_call_operand.vmem [shape: bf16[64,16], index: 1, kind: input, shape index: {}]   ;;  %s674_s2 = inlined_call_operand.vmem [shape: f32[64,1], index: 2, kind: input, shape index: {}]   ;;  %s675_s3 = inlined_call_operand.vmem [shape: bf16[32,64], index: 3, kind: input, shape index: {}]   ;;  %s676_s4 = inlined_call_operand.vmem [shape: f32[32,1], index: 4, kind: input, shape index: {}]   ;;  %s677_s5 = inlined_call_operand.vmem [shape: bf16[2,32], index: 5, kind: input, shape index: {}]   ;;  %s678_s6 = inlined_call_operand.vmem [shape: f32[2,1], index: 6, kind: input, shape index: {}]   ;;  %s679_s7 = inlined_call_operand.hbm [shape: f32[2,128], index: 7, kind: output, shape index: {}]  }
   0x1   :  { %v28_v0 = vld [vmem:[%s672_s0] sm:$0xff]  ;;  %v29_v1 = vld [vmem:[%s672_s0 + $0x8] sm:$0xff]  ;;  %v30_v2 = vld [vmem:[%s672_s0 + $0x10] sm:$0xff] }
   0x2   :  { %44 = vxpose.xlu0.b32.start [1/16] (narrow) %v28_v0, 16  ;;  %v472_v3 = vld [vmem:[%s673_s1] sm:$0xff]   ;;  %v31_v4 = vld [vmem:[%s672_s0 + $0x18] sm:$0xff] }
   0x6   :  { %45 = vxpose.xlu0.b32.cont [2/16] (narrow) %v29_v1, 16 }
   0xa   :  { %46 = vxpose.xlu0.b32.cont [3/16] (narrow) %v30_v2, 16 }
   0xb   :  { %12 = vsyncpa [#allocation3], 0  ;;  %438 = vmatprep.mubr.msk.bf16.mxu0 %vm153_vm0, %v472_v3  ;;  %v32_v5 = vld [vmem:[%s672_s0 + $0x20] sm:$0xff]  ;;  %v33_v6 = vld [vmem:[%s672_s0 + $0x28] sm:$0xff]  ;;  %v502_v8 = vmov 0   ;;  %vm281_vm1 = vcmask 523264  }
   0xc   :  { %v85_v7 = vld [vmem:[%s674_s2] sm:$0xff]  ;;  %470 = vset.pattern.permute.xlu1 %v502_v8  ;;  %v34_v9 = vld [vmem:[%s672_s0 + $0x30] sm:$0xff]  ;;  %v86_v10 = vld [vmem:[%s674_s2 + $0x8] sm:$0xff]  ;;  %vm504_vm2 = vmmov 0   ;;  %vm350_vm3 = vcmask 261120   ;;  %s505_s21 = smov [#allocation2]  }
   0xd   :  { %95 = vperm.xlu1 %470, %v85_v7   ;;  %v35_v11 = vld [vmem:[%s672_s0 + $0x38] sm:$0xff]  ;;  %v87_v12 = vld [vmem:[%s674_s2 + $0x10] sm:$0xff]  ;;  %v36_v13 = vld [vmem:[%s672_s0 + $0x40] sm:$0xff]  ;;  %s401_s22 = sshll.u32 %s505_s21, 4  ;;  %s402_s22 = int_to_ptr.vmem [resolvable:$true] %s401_s22 }
   0xe   :  { %47 = vxpose.xlu0.b32.cont [4/16] (narrow) %v31_v4, 16  ;;  %v88_v14 = vld [vmem:[%s674_s2 + $0x18] sm:$0xff]  ;;  %v37_v15 = vld [vmem:[%s672_s0 + $0x48] sm:$0xff]  ;;  %v89_v16 = vld [vmem:[%s674_s2 + $0x20] sm:$0xff]  ;;  %s478_s23 = scalar_lea.vmem %s402_s22, 32  ;;  %p483_p1 = scmp.lt.s32.totalorder %s402_s22, %s402_s22 }
   0xf   :  { %v38_v17 = vld [vmem:[%s672_s0 + $0x50] sm:$0xff]  ;;  %v90_v18 = vld [vmem:[%s674_s2 + $0x28] sm:$0xff]  ;;  %v39_v19 = vld [vmem:[%s672_s0 + $0x58] sm:$0xff]  ;;  %p479_p0 = scmp.ne.s32.totalorder %s402_s22, %s478_s23  ;;  %p484_p2 = scmp.lt.s32.totalorder %s478_s23, %s478_s23 }
  0x10   :  { %v91_v20 = vld [vmem:[%s674_s2 + $0x30] sm:$0xff]  ;;  %v40_v21 = vld [vmem:[%s672_s0 + $0x60] sm:$0xff]  ;;  %v92_v22 = vld [vmem:[%s674_s2 + $0x38] sm:$0xff] }
  0x11   :  { %100 = vperm.xlu1 %470, %v86_v10   ;;  %v41_v23 = vld [vmem:[%s672_s0 + $0x68] sm:$0xff]  ;;  %v247_v24 = vld [vmem:[%s676_s4] sm:$0xff]  ;;  %v42_v25 = vld [vmem:[%s672_s0 + $0x70] sm:$0xff]  ;;  %p485_p3 = por %p484_p2, %p483_p1 }
  0x12   :  { %48 = vxpose.xlu0.b32.cont [5/16] (narrow) %v32_v5, 16  ;;  %v248_v26 = vld [vmem:[%s676_s4 + $0x8] sm:$0xff]  ;;  %v43_v27 = vld [vmem:[%s672_s0 + $0x78] sm:$0xff]  ;;  %v249_v28 = vld [vmem:[%s676_s4 + $0x10] sm:$0xff] }
  0x13   :  { %v250_v29 = vld [vmem:[%s676_s4 + $0x18] sm:$0xff]  ;;  %v344_v30 = vld [vmem:[%s678_s6] sm:$0x3]  ;;  %v473_v34 = vld [vmem:[%s673_s1 + $0x8] sm:$0xff]   ;;  %p486_p4 = pnand %p485_p3, %p479_p0 }
  0x14   :  { %v474_v35 = vld [vmem:[%s673_s1 + $0x10] sm:$0xff]   ;;  %v475_v36 = vld [vmem:[%s673_s1 + $0x18] sm:$0xff]   ;;  %v476_v37 = vld [vmem:[%s675_s3] sm:$0xff]  }
  0x15   :  { %105 = vperm.xlu1 %470, %v87_v12   ;;  %454 = vmatprep.mubr.msk.bf16.mxu1 %vm281_vm1, %v476_v37  ;;  %v477_v10 = vld [vmem:[%s675_s3 + $0x8] sm:$0xff]  }
  0x16   :  { %49 = vxpose.xlu0.b32.cont [6/16] (narrow) %v33_v6, 16 }
  0x19   :  { %110 = vperm.xlu1 %470, %v88_v14  }
  0x1a   :  { %50 = vxpose.xlu0.b32.cont [7/16] (narrow) %v34_v9, 16 }
  0x1d   :  { %115 = vperm.xlu1 %470, %v89_v16  }
  0x1e   :  { %51 = vxpose.xlu0.b32.cont [8/16] (narrow) %v35_v11, 16  ;;  %v503_v11 = vmov 0.0  }
  0x21   :  { %120 = vperm.xlu1 %470, %v90_v18  }
  0x22   :  { %52 = vxpose.xlu0.b32.cont [9/16] (narrow) %v36_v13, 16 }
  0x25   :  { %125 = vperm.xlu1 %470, %v91_v20  }
  0x26   :  { %53 = vxpose.xlu0.b32.cont [10/16] (narrow) %v37_v15, 16 }
  0x29   :  { %130 = vperm.xlu1 %470, %v92_v22  }
  0x2a   :  { %54 = vxpose.xlu0.b32.cont [11/16] (narrow) %v38_v17, 16 }
  0x2d   :  { %253 = vperm.xlu1 %470, %v247_v24  }
  0x2e   :  { %55 = vxpose.xlu0.b32.cont [12/16] (narrow) %v39_v19, 16 }
  0x31   :  { %258 = vperm.xlu1 %470, %v248_v26  }
  0x32   :  { %56 = vxpose.xlu0.b32.cont [13/16] (narrow) %v40_v21, 16 }
  0x35   :  { %263 = vperm.xlu1 %470, %v249_v28  }
  0x36   :  { %57 = vxpose.xlu0.b32.cont [14/16] (narrow) %v41_v23, 16 }
  0x39   :  { %268 = vperm.xlu1 %470, %v250_v29  }
  0x3a   :  { %58 = vxpose.xlu0.b32.cont [15/16] (narrow) %v42_v25, 16 }
  0x3d   :  { %347 = vperm.xlu1 %470, %v344_v30   ;;  %v341_v30 = vld [vmem:[%s677_s5] sm:$0x1] }
  0x3e   :  { %59 = vxpose.xlu0.b32.end [16/16] (narrow) %v43_v27, 16 }
  0x67   :  { %471 = vset.pattern.permute.xlu0 %v502_v8 }
  0x82   :  { %v60_v31 = vpop.trf.xlu0 }
  0x86   :  { %v61_v32 = vpop.trf.xlu0 }
  0x87   :  { %v76_v33 = vpack.c.bf16 %v61_v32, %v60_v31 }
  0x89   :  { %436 = vmatprep.subr.bf16.mxu0 %v76_v33 }
  0x8a   :  { %437 = vmatpush3.bf16.msra.mxu0 %v76_v33 }
  0x8b   :  { %458 = vmatprep.subr.bf16.mxu0 %v503_v11 }
  0x8c   :  { %v96_v38 = vpop.permute.xlu1 %95 }
  0x8d   :  { %439 = vmatmul.mubr.msk.bf16.vlgmr.msra.gmra.mrb[0].mxu0 %vm153_vm0, %v473_v34 }
  0x8e   :  { %442 = vmatprep.mubr.msk.bf16.mxu0 %vm153_vm0, %v474_v35 }
  0x90   :  { %v101_v39 = vpop.permute.xlu1 %100 }
  0x94   :  { %v106_v40 = vpop.permute.xlu1 %105 }
  0x95   :  { %443 = vmatmul.mubr.msk.bf16.gmra.mrb[4].mxu0 %vm153_vm0, %v475_v36 }
  0x96   :  { %462 = vmatprep.mubr.msk.bf16.mxu0 %vm504_vm2, %v503_v11 }
  0x98   :  { %v111_v41 = vpop.permute.xlu1 %110 }
  0x9c   :  { %v116_v42 = vpop.permute.xlu1 %115 }
  0xa0   :  { %v121_v43 = vpop.permute.xlu1 %120 }
  0xa4   :  { %v126_v51 = vpop.permute.xlu1 %125 }
  0xa8   :  { %v131_v62 = vpop.permute.xlu1 %130 }
  0xac   :  { %v254_v12 = vpop.permute.xlu1 %253 }
  0xb0   :  { %v259_v13 = vpop.permute.xlu1 %258 }
  0xb4   :  { %v264_v14 = vpop.permute.xlu1 %263 }
  0xb8   :  { %v269_v18 = vpop.permute.xlu1 %268 }
  0xbc   :  { %v348_v31 = vpop.permute.xlu1 %347 }
 0x160   :  { %v440_v44 = vpop.f32.mrb[0].mxu0 }
 0x161   :  { %v209_v45 = vadd.f32 %v440_v44, %v106_v40  ;;  %v200_v46 = vpop.f32.mrb[1].mxu0 }
 0x162   :  { %v201_v47 = vadd.f32 %v200_v46, %v96_v38  ;;  %v441_v48 = vpop.f32.mrb[2].mxu0 }
 0x163   :  { %v212_v49 = vadd.f32 %v441_v48, %v111_v41  ;;  %v203_v50 = vpop.f32.mrb[3].mxu0  ;;  %v233_v53 = vmax.f32 %v209_v45, 0.0 }
 0x164   :  { %v204_v52 = vadd.f32 %v203_v50, %v101_v39  ;;  %v231_v55 = vmax.f32 %v201_v47, 0.0 }
 0x165   :  { %v234_v54 = vmax.f32 %v212_v49, 0.0 }
 0x166   :  { %v232_v56 = vmax.f32 %v204_v52, 0.0 }
 0x167   :  { %v244_v57 = vpack.c.bf16 %v234_v54, %v233_v53 }
 0x168   :  { %v444_v58 = vpop.f32.mrb[4].mxu0  ;;  %v243_v59 = vpack.c.bf16 %v232_v56, %v231_v55 }
 0x169   :  { %v225_v60 = vadd.f32 %v444_v58, %v126_v51  ;;  %v216_v61 = vpop.f32.mrb[5].mxu0 }
 0x16a   :  { %v217_v63 = vadd.f32 %v216_v61, %v116_v42  ;;  %v445_v0 = vpop.f32.mrb[6].mxu0  ;;  %446 = vmatprep.subr.bf16.mxu1 %v243_v59 }
 0x16b   :  { %v228_v1 = vadd.f32 %v445_v0, %v131_v62  ;;  %v219_v2 = vpop.f32.mrb[7].mxu0  ;;  %447 = vmatpush3.bf16.msra.mxu1 %v243_v59  ;;  %v237_v4 = vmax.f32 %v225_v60, 0.0 }
 0x16c   :  { %v220_v3 = vadd.f32 %v219_v2, %v121_v43  ;;  %448 = vmatprep.subr.bf16.mxu1 %v244_v57  ;;  %v235_v6 = vmax.f32 %v217_v63, 0.0 }
 0x16d   :  { %v238_v5 = vmax.f32 %v228_v1, 0.0 }
 0x16e   :  { %v236_v7 = vmax.f32 %v220_v3, 0.0 }
 0x16f   :  { %v246_v8 = vpack.c.bf16 %v238_v5, %v237_v4  ;;  %449 = vmatpush3.bf16.msra.mxu1 %v244_v57 }
 0x170   :  { %v245_v9 = vpack.c.bf16 %v236_v7, %v235_v6 }
 0x172   :  { %450 = vmatprep.subr.bf16.mxu1 %v245_v9 }
 0x173   :  { %451 = vmatpush3.bf16.msra.mxu1 %v245_v9 }
 0x174   :  { %452 = vmatprep.subr.bf16.mxu1 %v246_v8 }
 0x177   :  { %453 = vmatpush3.bf16.msra.mxu1 %v246_v8 }
 0x17a   :  { %455 = vmatmul.mubr.msk.bf16.vlgmr.msra.gmra.mrb[0].mxu1 %vm281_vm1, %v477_v10 }
 0x24d   :  { %v456_v15 = vpop.f32.mrb[0].mxu1 }
 0x24e   :  { %v331_v16 = vadd.f32 %v456_v15, %v264_v14  ;;  %v322_v17 = vpop.f32.mrb[1].mxu1 }
 0x24f   :  { %v323_v19 = vadd.f32 %v322_v17, %v254_v12  ;;  %v457_v20 = vpop.f32.mrb[2].mxu1 }
 0x250   :  { %v334_v21 = vadd.f32 %v457_v20, %v269_v18  ;;  %v325_v22 = vpop.f32.mrb[3].mxu1  ;;  %v339_v24 = vmax.f32 %v331_v16, 0.0 }
 0x251   :  { %v326_v23 = vadd.f32 %v325_v22, %v259_v13  ;;  %v337_v26 = vmax.f32 %v323_v19, 0.0 }
 0x252   :  { %v340_v25 = vmax.f32 %v334_v21, 0.0 }
 0x253   :  { %v338_v27 = vmax.f32 %v326_v23, 0.0 }
 0x254   :  { %v343_v28 = vpack.c.bf16 %v340_v25, %v339_v24 }
 0x255   :  { %v342_v29 = vpack.c.bf16 %v338_v27, %v337_v26 }
 0x257   :  { %459 = vmatpush3.bf16.msra.mxu0 %v342_v29 }
 0x258   :  { %460 = vmatprep.subr.bf16.mxu0 %v503_v11 }
 0x25b   :  { %461 = vmatpush3.bf16.msra.mxu0 %v343_v28 }
 0x25e   :  { %463 = vmatmul.mubr.msk.bf16.vlgmr.msra.gmra.mrb[8].mxu0 %vm350_vm3, %v341_v30 }
 0x331   :  { %v388_v32 = vpop.f32.mrb[8].mxu0 }
 0x332   :  { %v389_v33 = vadd.f32 %v388_v32, %v348_v31  ;;  %v464_v34 = vpop.f32.mrb[9].mxu0 }
 0x333   :  { %v391_v35 = vpop.f32.mrb[10].mxu0 }
 0x334   :  { %394 = vst [vmem:[#allocation2] sm:$0x3] %v389_v33  ;;  %v465_v36 = vpop.f32.mrb[11].mxu0 }
 0x335   :  { %489 = shalt.err (!%p486_p4)
}
 0x336   :  { %s490_s25 = scalar_lea.hbm %s679_s7, 32 }
 0x337   :  { %p491_p5 = scmp.ne.s32.totalorder %s679_s7, %s490_s25  ;;  %p494_p6 = scmp.lt.u32.totalorder %s490_s25, %s679_s7 }
 0x339   :  { %p496_p7 = pnand %p494_p6, %p491_p5 }
 0x33b   :  { %499 = shalt.err (!%p496_p7)
}
 0x33c   :  { %404 = dma.vmem_to_hbm [thread:$0]  %s402_s22, 32, %s679_s7, [#allocation3]  }
 0x33d   :  { %500 = dma.done.wait [#allocation3], 32  }
 0x33e   :  { %501 = vsyncadd [#allocation3], 4294967264 }
 0x33f   :  { %408 = vsyncpa [#allocation3], 1 }

</bundles_post_ra>
